<compile_context>
chip_gen: v7x
topology: tpu7x:2x2x1
jax: 0.10.0
libtpu: 0.0.40
codegen_flags: <defaults>
</compile_context>

<pallas_src>
import functools

import jax
import jax.numpy as jnp
from jax.experimental import pallas as pl
from jax.experimental.pallas import tpu as pltpu

EPS = 1e-5
C = 2            # in/out channels of every conv in the module
KS = (2, 2, 3)   # kernel sizes of conv1 / conv2 / conv3


def _conv_bn_relu(chans, p_ref, off, K, lane_idx, L_out, n, Lpad):
    """One fused Conv1d(C,C,K,valid) + BatchNorm1d(training) + ReLU layer.

    chans: list of C full-width (n, Lpad) f32 planes. Columns beyond the previous
    layer's valid width hold garbage; valid output columns never read them and
    they are masked out of the BN statistics.
    Returns list of C (n, Lpad) planes whose first L_out columns are valid.
    """
    w_off = off
    g_off = off + C * C * K
    be_off = g_off + C

    # Hoisted lane-shifted planes, shared by both output channels:
    #   shifted[ci][k][:, j] == chans[ci][:, j + k]   for j + k < Lpad
    shifted = []
    for ci in range(C):
        s = [chans[ci]]
        for k in range(1, K):
            s.append(pltpu.roll(chans[ci], Lpad - k, 1))   # left-shift by k (XLU)
        shifted.append(s)

    # One hoisted mask of valid output columns (used only for BN statistics).
    mask_f = (lane_idx < L_out).astype(jnp.float32)
    inv_cnt = 1.0 / float(n * L_out)

    # Conv on the VPU (scalar-broadcast MACs). Conv bias intentionally omitted:
    # training-mode BN subtracts the per-channel batch mean, cancelling it exactly.
    accs = []
    for co in range(C):
        acc = None
        for ci in range(C):
            for k in range(K):
                w = p_ref[w_off + (co * C + ci) * K + k]
                t = w * shifted[ci][k]
                acc = t if acc is None else acc + t
        accs.append(acc)

    # BN batch stats (biased variance) for BOTH channels first, so the two
    # reduce->rsqrt chains interleave. Lane reduce (keepdims) then sublane reduce.
    stats = []
    for co in range(C):
        masked = accs[co] * mask_f
        row_s = jnp.sum(masked, axis=-1, keepdims=True)
        row_q = jnp.sum(masked * accs[co], axis=-1, keepdims=True)
        mean = jnp.sum(row_s) * inv_cnt
        ex2 = jnp.sum(row_q) * inv_cnt
        stats.append((mean, ex2))

    # Folded BN affine + ReLU: y = max(acc * scale + shift, 0)  (2 VPU passes).
    out = []
    for co in range(C):
        mean, ex2 = stats[co]
        var = jnp.maximum(ex2 - mean * mean, 0.0)          # clamp cancellation
        scale = p_ref[g_off + co] * jax.lax.rsqrt(var + EPS)
        shift = p_ref[be_off + co] - mean * scale
        out.append(jnp.maximum(accs[co] * scale + shift, 0.0))
    return out


def model_kernel(x_ref, p_ref, o_ref, *, L):
    # x_ref is (C, N, Lpad): each channel plane is a contiguous leading-axis slice.
    _, n, Lpad = x_ref.shape
    chans = [x_ref[ci].astype(jnp.float32) for ci in range(C)]
    lane_idx = jax.lax.broadcasted_iota(jnp.int32, (n, Lpad), 1)   # hoisted once
    off = 0
    L_cur = L
    for K in KS:
        L_cur -= K - 1
        chans = _conv_bn_relu(chans, p_ref, off, K, lane_idx, L_cur, n, Lpad)
        off += C * C * K + 2 * C
    for co in range(C):
        # Full-width, lane-dense, unmasked store; padded tail is sliced off
        # wrapper-side (garbage there is finite, never consumed).
        o_ref[co] = chans[co].astype(o_ref.dtype)


@jax.jit
def model_forward(x, packed_params):
    n, c, L = x.shape
    assert c == C
    L_out = L - sum(k - 1 for k in KS)
    assert L_out > 0, "sequence too short for the three valid convolutions"
    Lpad = max(128, ((L + 127) // 128) * 128)

    # Single-block design: whole (C, n, Lpad) tensor + intermediates live in VMEM.
    # Guard so we never silently exceed the scoped-VMEM budget on any generation.
    # TODO(synk): grid over n / L blocks with two-phase BN stats for non-toy sizes.
    assert C * n * Lpad * 4 * 8 <= 16 * 1024 * 1024, "single-block path is for small inputs"

    # Channel-major planes; at these toy sizes the transpose/pad is negligible.
    # TODO(synk): at scale, keep (N, C, L) in HBM and let a gridded index_map read
    # per-channel planes so the two wrapper transposes disappear.
    x_cnl = jnp.transpose(x, (1, 0, 2))
    x_cnl = jnp.pad(x_cnl, ((0, 0), (0, 0), (0, Lpad - L)))

    out_cnl = pl.pallas_call(
        functools.partial(model_kernel, L=L),
        out_shape=jax.ShapeDtypeStruct((C, n, Lpad), x.dtype),
        in_specs=[pl.BlockSpec(memory_space=pltpu.MemorySpace.VMEM),
                  pl.BlockSpec(memory_space=pltpu.MemorySpace.SMEM)],
        out_specs=pl.BlockSpec(memory_space=pltpu.MemorySpace.VMEM),
        compiler_params=pltpu.CompilerParams(vmem_limit_bytes=32 * 1024 * 1024),
    )(x_cnl, packed_params)

    # Drop padded tail + back to (N, C, L_out); XLA fuses slice+transpose.
    return jnp.transpose(out_cnl[:, :, :L_out], (1, 0, 2))


def init_params(key):
    """PyTorch-style uniform(+/- 1/sqrt(fan_in)) conv params (incl. bias for the
    reference), BatchNorm gamma=1, beta=0."""
    layers = []
    for K in KS:
        key, kw, kb = jax.random.split(key, 3)
        fan_in = C * K
        bound = 1.0 / (fan_in ** 0.5)
        w = jax.random.uniform(kw, (C, C, K), jnp.float32, -bound, bound)
        b = jax.random.uniform(kb, (C,), jnp.float32, -bound, bound)
        g = jnp.ones((C,), jnp.float32)
        be = jnp.zeros((C,), jnp.float32)
        layers.append((w, b, g, be))
    return layers


def pack_params(layers):
    """Flatten [w | gamma | beta] per layer into one f32 SMEM vector.
    Conv bias is intentionally excluded: training-mode BN subtracts the
    per-channel batch mean, so a constant bias cancels exactly."""
    pieces = []
    for (w, _b, g, be) in layers:
        pieces += [w.reshape(-1), g, be]
    return jnp.concatenate(pieces)


def reference(x, layers):
    """Pure-JAX reference of the same forward pass (with conv bias, as PyTorch)."""
    out = x
    for (w, b, g, be) in layers:
        y = jax.lax.conv_general_dilated(
            out, w, window_strides=(1,), padding='VALID',
            dimension_numbers=('NCH', 'OIH', 'NCH'))
        y = y + b[None, :, None]
        mean = jnp.mean(y, axis=(0, 2), keepdims=True)
        var = jnp.mean((y - mean) ** 2, axis=(0, 2), keepdims=True)
        y = (y - mean) / jnp.sqrt(var + EPS) * g[None, :, None] + be[None, :, None]
        out = jnp.maximum(y, 0.0)
    return out


if __name__ == "__main__":
    key = jax.random.PRNGKey(0)
    kx, kp = jax.random.split(key)
    # Module fixes channels=2; pick batch=2, seq=16 (original L=3 would make conv3 invalid).
    x = jax.random.normal(kx, (2, 2, 16), dtype=jnp.float32)
    layers = init_params(kp)
    packed = pack_params(layers)

    out = jax.block_until_ready(model_forward(x, packed))

    ref = reference(x, layers)
    assert out.shape == (2, 2, 12), out.shape
    assert jnp.allclose(out, ref, rtol=1e-3, atol=1e-3), float(jnp.max(jnp.abs(out - ref)))

    print("KERNEL_OK")
</pallas_src>

<mosaic_0001>
module attributes {stable_mosaic.version = 11 : i64} {
  func.func @model_kernel(%arg0: memref<2x2x128xf32, #tpu.memory_space<vmem>>, %arg1: memref<40xf32, #tpu.memory_space<smem>>, %arg2: memref<2x2x128xf32, #tpu.memory_space<vmem>>) attributes {dimension_semantics = [], scalar_prefetch = 0 : i64, scratch_operands = 0 : i64, tpu.core_type = #tpu.core_type<tc>} {
    %c0 = arith.constant 0 : index
    %c0_0 = arith.constant 0 : index
    %c0_1 = arith.constant 0 : index
    %0 = vector.load %arg0[%c0, %c0_0, %c0_1] : memref<2x2x128xf32, #tpu.memory_space<vmem>>, vector<1x2x128xf32>
    %1 = vector.shape_cast %0 : vector<1x2x128xf32> to vector<2x128xf32>
    %c1 = arith.constant 1 : index
    %c0_2 = arith.constant 0 : index
    %c0_3 = arith.constant 0 : index
    %2 = vector.load %arg0[%c1, %c0_2, %c0_3] : memref<2x2x128xf32, #tpu.memory_space<vmem>>, vector<1x2x128xf32>
    %3 = vector.shape_cast %2 : vector<1x2x128xf32> to vector<2x128xf32>
    %4 = tpu.iota {dimensions = array<i32: 1>} : vector<2x128xi32>
    %c127_i32 = arith.constant 127 : i32
    %5 = tpu.dynamic_rotate %1 by %c127_i32 dim 1 : vector<2x128xf32>, i32 -> vector<2x128xf32>
    %c127_i32_4 = arith.constant 127 : i32
    %6 = tpu.dynamic_rotate %3 by %c127_i32_4 dim 1 : vector<2x128xf32>, i32 -> vector<2x128xf32>
    %c15_i32 = arith.constant 15 : i32
    %7 = vector.broadcast %c15_i32 : i32 to vector<2x128xi32>
    %8 = arith.cmpi slt, %4, %7 : vector<2x128xi32>
    %9 = arith.extui %8 : vector<2x128xi1> to vector<2x128xi32>
    %10 = arith.sitofp %9 : vector<2x128xi32> to vector<2x128xf32>
    %c0_5 = arith.constant 0 : index
    %11 = memref.load %arg1[%c0_5] : memref<40xf32, #tpu.memory_space<smem>>
    %12 = vector.broadcast %11 : f32 to vector<2x128xf32>
    %13 = arith.mulf %12, %1 : vector<2x128xf32>
    %c1_6 = arith.constant 1 : index
    %14 = memref.load %arg1[%c1_6] : memref<40xf32, #tpu.memory_space<smem>>
    %15 = vector.broadcast %14 : f32 to vector<2x128xf32>
    %16 = arith.mulf %15, %5 : vector<2x128xf32>
    %17 = arith.addf %13, %16 : vector<2x128xf32>
    %c2 = arith.constant 2 : index
    %18 = memref.load %arg1[%c2] : memref<40xf32, #tpu.memory_space<smem>>
    %19 = vector.broadcast %18 : f32 to vector<2x128xf32>
    %20 = arith.mulf %19, %3 : vector<2x128xf32>
    %21 = arith.addf %17, %20 : vector<2x128xf32>
    %c3 = arith.constant 3 : index
    %22 = memref.load %arg1[%c3] : memref<40xf32, #tpu.memory_space<smem>>
    %23 = vector.broadcast %22 : f32 to vector<2x128xf32>
    %24 = arith.mulf %23, %6 : vector<2x128xf32>
    %25 = arith.addf %21, %24 : vector<2x128xf32>
    %c4 = arith.constant 4 : index
    %26 = memref.load %arg1[%c4] : memref<40xf32, #tpu.memory_space<smem>>
    %27 = vector.broadcast %26 : f32 to vector<2x128xf32>
    %28 = arith.mulf %27, %1 : vector<2x128xf32>
    %c5 = arith.constant 5 : index
    %29 = memref.load %arg1[%c5] : memref<40xf32, #tpu.memory_space<smem>>
    %30 = vector.broadcast %29 : f32 to vector<2x128xf32>
    %31 = arith.mulf %30, %5 : vector<2x128xf32>
    %32 = arith.addf %28, %31 : vector<2x128xf32>
    %c6 = arith.constant 6 : index
    %33 = memref.load %arg1[%c6] : memref<40xf32, #tpu.memory_space<smem>>
    %34 = vector.broadcast %33 : f32 to vector<2x128xf32>
    %35 = arith.mulf %34, %3 : vector<2x128xf32>
    %36 = arith.addf %32, %35 : vector<2x128xf32>
    %c7 = arith.constant 7 : index
    %37 = memref.load %arg1[%c7] : memref<40xf32, #tpu.memory_space<smem>>
    %38 = vector.broadcast %37 : f32 to vector<2x128xf32>
    %39 = arith.mulf %38, %6 : vector<2x128xf32>
    %40 = arith.addf %36, %39 : vector<2x128xf32>
    %41 = arith.mulf %25, %10 : vector<2x128xf32>
    %cst = arith.constant dense<0.000000e+00> : vector<2xf32>
    %42 = vector.multi_reduction <add>, %41, %cst [1] : vector<2x128xf32> to vector<2xf32>
    %43 = vector.shape_cast %42 : vector<2xf32> to vector<2x1xf32>
    %44 = arith.mulf %41, %25 : vector<2x128xf32>
    %cst_7 = arith.constant dense<0.000000e+00> : vector<2xf32>
    %45 = vector.multi_reduction <add>, %44, %cst_7 [1] : vector<2x128xf32> to vector<2xf32>
    %46 = vector.shape_cast %45 : vector<2xf32> to vector<2x1xf32>
    %47 = vector.shape_cast %43 : vector<2x1xf32> to vector<1x2x1xf32>
    %cst_8 = arith.constant dense<0.000000e+00> : vector<1xf32>
    %48 = vector.multi_reduction <add>, %47, %cst_8 [1, 2] : vector<1x2x1xf32> to vector<1xf32>
    %49 = vector.shape_cast %48 : vector<1xf32> to vector<1x1x1xf32>
    %50 = vector.extract %49[0, 0, 0] : f32 from vector<1x1x1xf32>
    %cst_9 = arith.constant 0.0333333351 : f32
    %51 = arith.mulf %50, %cst_9 : f32
    %52 = vector.shape_cast %46 : vector<2x1xf32> to vector<1x2x1xf32>
    %cst_10 = arith.constant dense<0.000000e+00> : vector<1xf32>
    %53 = vector.multi_reduction <add>, %52, %cst_10 [1, 2] : vector<1x2x1xf32> to vector<1xf32>
    %54 = vector.shape_cast %53 : vector<1xf32> to vector<1x1x1xf32>
    %55 = vector.extract %54[0, 0, 0] : f32 from vector<1x1x1xf32>
    %cst_11 = arith.constant 0.0333333351 : f32
    %56 = arith.mulf %55, %cst_11 : f32
    %57 = arith.mulf %40, %10 : vector<2x128xf32>
    %cst_12 = arith.constant dense<0.000000e+00> : vector<2xf32>
    %58 = vector.multi_reduction <add>, %57, %cst_12 [1] : vector<2x128xf32> to vector<2xf32>
    %59 = vector.shape_cast %58 : vector<2xf32> to vector<2x1xf32>
    %60 = arith.mulf %57, %40 : vector<2x128xf32>
    %cst_13 = arith.constant dense<0.000000e+00> : vector<2xf32>
    %61 = vector.multi_reduction <add>, %60, %cst_13 [1] : vector<2x128xf32> to vector<2xf32>
    %62 = vector.shape_cast %61 : vector<2xf32> to vector<2x1xf32>
    %63 = vector.shape_cast %59 : vector<2x1xf32> to vector<1x2x1xf32>
    %cst_14 = arith.constant dense<0.000000e+00> : vector<1xf32>
    %64 = vector.multi_reduction <add>, %63, %cst_14 [1, 2] : vector<1x2x1xf32> to vector<1xf32>
    %65 = vector.shape_cast %64 : vector<1xf32> to vector<1x1x1xf32>
    %66 = vector.extract %65[0, 0, 0] : f32 from vector<1x1x1xf32>
    %cst_15 = arith.constant 0.0333333351 : f32
    %67 = arith.mulf %66, %cst_15 : f32
    %68 = vector.shape_cast %62 : vector<2x1xf32> to vector<1x2x1xf32>
    %cst_16 = arith.constant dense<0.000000e+00> : vector<1xf32>
    %69 = vector.multi_reduction <add>, %68, %cst_16 [1, 2] : vector<1x2x1xf32> to vector<1xf32>
    %70 = vector.shape_cast %69 : vector<1xf32> to vector<1x1x1xf32>
    %71 = vector.extract %70[0, 0, 0] : f32 from vector<1x1x1xf32>
    %cst_17 = arith.constant 0.0333333351 : f32
    %72 = arith.mulf %71, %cst_17 : f32
    %73 = arith.mulf %51, %51 : f32
    %74 = arith.subf %56, %73 : f32
    %cst_18 = arith.constant 0.000000e+00 : f32
    %75 = arith.maximumf %74, %cst_18 : f32
    %c8 = arith.constant 8 : index
    %76 = memref.load %arg1[%c8] : memref<40xf32, #tpu.memory_space<smem>>
    %cst_19 = arith.constant 9.99999974E-6 : f32
    %77 = arith.addf %75, %cst_19 : f32
    %78 = math.rsqrt %77 : f32
    %79 = arith.mulf %76, %78 : f32
    %c10 = arith.constant 10 : index
    %80 = memref.load %arg1[%c10] : memref<40xf32, #tpu.memory_space<smem>>
    %81 = arith.mulf %51, %79 : f32
    %82 = arith.subf %80, %81 : f32
    %83 = vector.broadcast %79 : f32 to vector<2x128xf32>
    %84 = arith.mulf %25, %83 : vector<2x128xf32>
    %85 = vector.broadcast %82 : f32 to vector<2x128xf32>
    %86 = arith.addf %84, %85 : vector<2x128xf32>
    %cst_20 = arith.constant 0.000000e+00 : f32
    %87 = vector.broadcast %cst_20 : f32 to vector<2x128xf32>
    %88 = arith.maximumf %86, %87 : vector<2x128xf32>
    %89 = arith.mulf %67, %67 : f32
    %90 = arith.subf %72, %89 : f32
    %cst_21 = arith.constant 0.000000e+00 : f32
    %91 = arith.maximumf %90, %cst_21 : f32
    %c9 = arith.constant 9 : index
    %92 = memref.load %arg1[%c9] : memref<40xf32, #tpu.memory_space<smem>>
    %cst_22 = arith.constant 9.99999974E-6 : f32
    %93 = arith.addf %91, %cst_22 : f32
    %94 = math.rsqrt %93 : f32
    %95 = arith.mulf %92, %94 : f32
    %c11 = arith.constant 11 : index
    %96 = memref.load %arg1[%c11] : memref<40xf32, #tpu.memory_space<smem>>
    %97 = arith.mulf %67, %95 : f32
    %98 = arith.subf %96, %97 : f32
    %99 = vector.broadcast %95 : f32 to vector<2x128xf32>
    %100 = arith.mulf %40, %99 : vector<2x128xf32>
    %101 = vector.broadcast %98 : f32 to vector<2x128xf32>
    %102 = arith.addf %100, %101 : vector<2x128xf32>
    %cst_23 = arith.constant 0.000000e+00 : f32
    %103 = vector.broadcast %cst_23 : f32 to vector<2x128xf32>
    %104 = arith.maximumf %102, %103 : vector<2x128xf32>
    %c127_i32_24 = arith.constant 127 : i32
    %105 = tpu.dynamic_rotate %88 by %c127_i32_24 dim 1 : vector<2x128xf32>, i32 -> vector<2x128xf32>
    %c127_i32_25 = arith.constant 127 : i32
    %106 = tpu.dynamic_rotate %104 by %c127_i32_25 dim 1 : vector<2x128xf32>, i32 -> vector<2x128xf32>
    %c14_i32 = arith.constant 14 : i32
    %107 = vector.broadcast %c14_i32 : i32 to vector<2x128xi32>
    %108 = arith.cmpi slt, %4, %107 : vector<2x128xi32>
    %109 = arith.extui %108 : vector<2x128xi1> to vector<2x128xi32>
    %110 = arith.sitofp %109 : vector<2x128xi32> to vector<2x128xf32>
    %c12 = arith.constant 12 : index
    %111 = memref.load %arg1[%c12] : memref<40xf32, #tpu.memory_space<smem>>
    %112 = vector.broadcast %111 : f32 to vector<2x128xf32>
    %113 = arith.mulf %112, %88 : vector<2x128xf32>
    %c13 = arith.constant 13 : index
    %114 = memref.load %arg1[%c13] : memref<40xf32, #tpu.memory_space<smem>>
    %115 = vector.broadcast %114 : f32 to vector<2x128xf32>
    %116 = arith.mulf %115, %105 : vector<2x128xf32>
    %117 = arith.addf %113, %116 : vector<2x128xf32>
    %c14 = arith.constant 14 : index
    %118 = memref.load %arg1[%c14] : memref<40xf32, #tpu.memory_space<smem>>
    %119 = vector.broadcast %118 : f32 to vector<2x128xf32>
    %120 = arith.mulf %119, %104 : vector<2x128xf32>
    %121 = arith.addf %117, %120 : vector<2x128xf32>
    %c15 = arith.constant 15 : index
    %122 = memref.load %arg1[%c15] : memref<40xf32, #tpu.memory_space<smem>>
    %123 = vector.broadcast %122 : f32 to vector<2x128xf32>
    %124 = arith.mulf %123, %106 : vector<2x128xf32>
    %125 = arith.addf %121, %124 : vector<2x128xf32>
    %c16 = arith.constant 16 : index
    %126 = memref.load %arg1[%c16] : memref<40xf32, #tpu.memory_space<smem>>
    %127 = vector.broadcast %126 : f32 to vector<2x128xf32>
    %128 = arith.mulf %127, %88 : vector<2x128xf32>
    %c17 = arith.constant 17 : index
    %129 = memref.load %arg1[%c17] : memref<40xf32, #tpu.memory_space<smem>>
    %130 = vector.broadcast %129 : f32 to vector<2x128xf32>
    %131 = arith.mulf %130, %105 : vector<2x128xf32>
    %132 = arith.addf %128, %131 : vector<2x128xf32>
    %c18 = arith.constant 18 : index
    %133 = memref.load %arg1[%c18] : memref<40xf32, #tpu.memory_space<smem>>
    %134 = vector.broadcast %133 : f32 to vector<2x128xf32>
    %135 = arith.mulf %134, %104 : vector<2x128xf32>
    %136 = arith.addf %132, %135 : vector<2x128xf32>
    %c19 = arith.constant 19 : index
    %137 = memref.load %arg1[%c19] : memref<40xf32, #tpu.memory_space<smem>>
    %138 = vector.broadcast %137 : f32 to vector<2x128xf32>
    %139 = arith.mulf %138, %106 : vector<2x128xf32>
    %140 = arith.addf %136, %139 : vector<2x128xf32>
    %141 = arith.mulf %125, %110 : vector<2x128xf32>
    %cst_26 = arith.constant dense<0.000000e+00> : vector<2xf32>
    %142 = vector.multi_reduction <add>, %141, %cst_26 [1] : vector<2x128xf32> to vector<2xf32>
    %143 = vector.shape_cast %142 : vector<2xf32> to vector<2x1xf32>
    %144 = arith.mulf %141, %125 : vector<2x128xf32>
    %cst_27 = arith.constant dense<0.000000e+00> : vector<2xf32>
    %145 = vector.multi_reduction <add>, %144, %cst_27 [1] : vector<2x128xf32> to vector<2xf32>
    %146 = vector.shape_cast %145 : vector<2xf32> to vector<2x1xf32>
    %147 = vector.shape_cast %143 : vector<2x1xf32> to vector<1x2x1xf32>
    %cst_28 = arith.constant dense<0.000000e+00> : vector<1xf32>
    %148 = vector.multi_reduction <add>, %147, %cst_28 [1, 2] : vector<1x2x1xf32> to vector<1xf32>
    %149 = vector.shape_cast %148 : vector<1xf32> to vector<1x1x1xf32>
    %150 = vector.extract %149[0, 0, 0] : f32 from vector<1x1x1xf32>
    %cst_29 = arith.constant 0.0357142873 : f32
    %151 = arith.mulf %150, %cst_29 : f32
    %152 = vector.shape_cast %146 : vector<2x1xf32> to vector<1x2x1xf32>
    %cst_30 = arith.constant dense<0.000000e+00> : vector<1xf32>
    %153 = vector.multi_reduction <add>, %152, %cst_30 [1, 2] : vector<1x2x1xf32> to vector<1xf32>
    %154 = vector.shape_cast %153 : vector<1xf32> to vector<1x1x1xf32>
    %155 = vector.extract %154[0, 0, 0] : f32 from vector<1x1x1xf32>
    %cst_31 = arith.constant 0.0357142873 : f32
    %156 = arith.mulf %155, %cst_31 : f32
    %157 = arith.mulf %140, %110 : vector<2x128xf32>
    %cst_32 = arith.constant dense<0.000000e+00> : vector<2xf32>
    %158 = vector.multi_reduction <add>, %157, %cst_32 [1] : vector<2x128xf32> to vector<2xf32>
    %159 = vector.shape_cast %158 : vector<2xf32> to vector<2x1xf32>
    %160 = arith.mulf %157, %140 : vector<2x128xf32>
    %cst_33 = arith.constant dense<0.000000e+00> : vector<2xf32>
    %161 = vector.multi_reduction <add>, %160, %cst_33 [1] : vector<2x128xf32> to vector<2xf32>
    %162 = vector.shape_cast %161 : vector<2xf32> to vector<2x1xf32>
    %163 = vector.shape_cast %159 : vector<2x1xf32> to vector<1x2x1xf32>
    %cst_34 = arith.constant dense<0.000000e+00> : vector<1xf32>
    %164 = vector.multi_reduction <add>, %163, %cst_34 [1, 2] : vector<1x2x1xf32> to vector<1xf32>
    %165 = vector.shape_cast %164 : vector<1xf32> to vector<1x1x1xf32>
    %166 = vector.extract %165[0, 0, 0] : f32 from vector<1x1x1xf32>
    %cst_35 = arith.constant 0.0357142873 : f32
    %167 = arith.mulf %166, %cst_35 : f32
    %168 = vector.shape_cast %162 : vector<2x1xf32> to vector<1x2x1xf32>
    %cst_36 = arith.constant dense<0.000000e+00> : vector<1xf32>
    %169 = vector.multi_reduction <add>, %168, %cst_36 [1, 2] : vector<1x2x1xf32> to vector<1xf32>
    %170 = vector.shape_cast %169 : vector<1xf32> to vector<1x1x1xf32>
    %171 = vector.extract %170[0, 0, 0] : f32 from vector<1x1x1xf32>
    %cst_37 = arith.constant 0.0357142873 : f32
    %172 = arith.mulf %171, %cst_37 : f32
    %173 = arith.mulf %151, %151 : f32
    %174 = arith.subf %156, %173 : f32
    %cst_38 = arith.constant 0.000000e+00 : f32
    %175 = arith.maximumf %174, %cst_38 : f32
    %c20 = arith.constant 20 : index
    %176 = memref.load %arg1[%c20] : memref<40xf32, #tpu.memory_space<smem>>
    %cst_39 = arith.constant 9.99999974E-6 : f32
    %177 = arith.addf %175, %cst_39 : f32
    %178 = math.rsqrt %177 : f32
    %179 = arith.mulf %176, %178 : f32
    %c22 = arith.constant 22 : index
    %180 = memref.load %arg1[%c22] : memref<40xf32, #tpu.memory_space<smem>>
    %181 = arith.mulf %151, %179 : f32
    %182 = arith.subf %180, %181 : f32
    %183 = vector.broadcast %179 : f32 to vector<2x128xf32>
    %184 = arith.mulf %125, %183 : vector<2x128xf32>
    %185 = vector.broadcast %182 : f32 to vector<2x128xf32>
    %186 = arith.addf %184, %185 : vector<2x128xf32>
    %cst_40 = arith.constant 0.000000e+00 : f32
    %187 = vector.broadcast %cst_40 : f32 to vector<2x128xf32>
    %188 = arith.maximumf %186, %187 : vector<2x128xf32>
    %189 = arith.mulf %167, %167 : f32
    %190 = arith.subf %172, %189 : f32
    %cst_41 = arith.constant 0.000000e+00 : f32
    %191 = arith.maximumf %190, %cst_41 : f32
    %c21 = arith.constant 21 : index
    %192 = memref.load %arg1[%c21] : memref<40xf32, #tpu.memory_space<smem>>
    %cst_42 = arith.constant 9.99999974E-6 : f32
    %193 = arith.addf %191, %cst_42 : f32
    %194 = math.rsqrt %193 : f32
    %195 = arith.mulf %192, %194 : f32
    %c23 = arith.constant 23 : index
    %196 = memref.load %arg1[%c23] : memref<40xf32, #tpu.memory_space<smem>>
    %197 = arith.mulf %167, %195 : f32
    %198 = arith.subf %196, %197 : f32
    %199 = vector.broadcast %195 : f32 to vector<2x128xf32>
    %200 = arith.mulf %140, %199 : vector<2x128xf32>
    %201 = vector.broadcast %198 : f32 to vector<2x128xf32>
    %202 = arith.addf %200, %201 : vector<2x128xf32>
    %cst_43 = arith.constant 0.000000e+00 : f32
    %203 = vector.broadcast %cst_43 : f32 to vector<2x128xf32>
    %204 = arith.maximumf %202, %203 : vector<2x128xf32>
    %c127_i32_44 = arith.constant 127 : i32
    %205 = tpu.dynamic_rotate %188 by %c127_i32_44 dim 1 : vector<2x128xf32>, i32 -> vector<2x128xf32>
    %c126_i32 = arith.constant 126 : i32
    %206 = tpu.dynamic_rotate %188 by %c126_i32 dim 1 : vector<2x128xf32>, i32 -> vector<2x128xf32>
    %c127_i32_45 = arith.constant 127 : i32
    %207 = tpu.dynamic_rotate %204 by %c127_i32_45 dim 1 : vector<2x128xf32>, i32 -> vector<2x128xf32>
    %c126_i32_46 = arith.constant 126 : i32
    %208 = tpu.dynamic_rotate %204 by %c126_i32_46 dim 1 : vector<2x128xf32>, i32 -> vector<2x128xf32>
    %c12_i32 = arith.constant 12 : i32
    %209 = vector.broadcast %c12_i32 : i32 to vector<2x128xi32>
    %210 = arith.cmpi slt, %4, %209 : vector<2x128xi32>
    %211 = arith.extui %210 : vector<2x128xi1> to vector<2x128xi32>
    %212 = arith.sitofp %211 : vector<2x128xi32> to vector<2x128xf32>
    %c24 = arith.constant 24 : index
    %213 = memref.load %arg1[%c24] : memref<40xf32, #tpu.memory_space<smem>>
    %214 = vector.broadcast %213 : f32 to vector<2x128xf32>
    %215 = arith.mulf %214, %188 : vector<2x128xf32>
    %c25 = arith.constant 25 : index
    %216 = memref.load %arg1[%c25] : memref<40xf32, #tpu.memory_space<smem>>
    %217 = vector.broadcast %216 : f32 to vector<2x128xf32>
    %218 = arith.mulf %217, %205 : vector<2x128xf32>
    %219 = arith.addf %215, %218 : vector<2x128xf32>
    %c26 = arith.constant 26 : index
    %220 = memref.load %arg1[%c26] : memref<40xf32, #tpu.memory_space<smem>>
    %221 = vector.broadcast %220 : f32 to vector<2x128xf32>
    %222 = arith.mulf %221, %206 : vector<2x128xf32>
    %223 = arith.addf %219, %222 : vector<2x128xf32>
    %c27 = arith.constant 27 : index
    %224 = memref.load %arg1[%c27] : memref<40xf32, #tpu.memory_space<smem>>
    %225 = vector.broadcast %224 : f32 to vector<2x128xf32>
    %226 = arith.mulf %225, %204 : vector<2x128xf32>
    %227 = arith.addf %223, %226 : vector<2x128xf32>
    %c28 = arith.constant 28 : index
    %228 = memref.load %arg1[%c28] : memref<40xf32, #tpu.memory_space<smem>>
    %229 = vector.broadcast %228 : f32 to vector<2x128xf32>
    %230 = arith.mulf %229, %207 : vector<2x128xf32>
    %231 = arith.addf %227, %230 : vector<2x128xf32>
    %c29 = arith.constant 29 : index
    %232 = memref.load %arg1[%c29] : memref<40xf32, #tpu.memory_space<smem>>
    %233 = vector.broadcast %232 : f32 to vector<2x128xf32>
    %234 = arith.mulf %233, %208 : vector<2x128xf32>
    %235 = arith.addf %231, %234 : vector<2x128xf32>
    %c30 = arith.constant 30 : index
    %236 = memref.load %arg1[%c30] : memref<40xf32, #tpu.memory_space<smem>>
    %237 = vector.broadcast %236 : f32 to vector<2x128xf32>
    %238 = arith.mulf %237, %188 : vector<2x128xf32>
    %c31 = arith.constant 31 : index
    %239 = memref.load %arg1[%c31] : memref<40xf32, #tpu.memory_space<smem>>
    %240 = vector.broadcast %239 : f32 to vector<2x128xf32>
    %241 = arith.mulf %240, %205 : vector<2x128xf32>
    %242 = arith.addf %238, %241 : vector<2x128xf32>
    %c32 = arith.constant 32 : index
    %243 = memref.load %arg1[%c32] : memref<40xf32, #tpu.memory_space<smem>>
    %244 = vector.broadcast %243 : f32 to vector<2x128xf32>
    %245 = arith.mulf %244, %206 : vector<2x128xf32>
    %246 = arith.addf %242, %245 : vector<2x128xf32>
    %c33 = arith.constant 33 : index
    %247 = memref.load %arg1[%c33] : memref<40xf32, #tpu.memory_space<smem>>
    %248 = vector.broadcast %247 : f32 to vector<2x128xf32>
    %249 = arith.mulf %248, %204 : vector<2x128xf32>
    %250 = arith.addf %246, %249 : vector<2x128xf32>
    %c34 = arith.constant 34 : index
    %251 = memref.load %arg1[%c34] : memref<40xf32, #tpu.memory_space<smem>>
    %252 = vector.broadcast %251 : f32 to vector<2x128xf32>
    %253 = arith.mulf %252, %207 : vector<2x128xf32>
    %254 = arith.addf %250, %253 : vector<2x128xf32>
    %c35 = arith.constant 35 : index
    %255 = memref.load %arg1[%c35] : memref<40xf32, #tpu.memory_space<smem>>
    %256 = vector.broadcast %255 : f32 to vector<2x128xf32>
    %257 = arith.mulf %256, %208 : vector<2x128xf32>
    %258 = arith.addf %254, %257 : vector<2x128xf32>
    %259 = arith.mulf %235, %212 : vector<2x128xf32>
    %cst_47 = arith.constant dense<0.000000e+00> : vector<2xf32>
    %260 = vector.multi_reduction <add>, %259, %cst_47 [1] : vector<2x128xf32> to vector<2xf32>
    %261 = vector.shape_cast %260 : vector<2xf32> to vector<2x1xf32>
    %262 = arith.mulf %259, %235 : vector<2x128xf32>
    %cst_48 = arith.constant dense<0.000000e+00> : vector<2xf32>
    %263 = vector.multi_reduction <add>, %262, %cst_48 [1] : vector<2x128xf32> to vector<2xf32>
    %264 = vector.shape_cast %263 : vector<2xf32> to vector<2x1xf32>
    %265 = vector.shape_cast %261 : vector<2x1xf32> to vector<1x2x1xf32>
    %cst_49 = arith.constant dense<0.000000e+00> : vector<1xf32>
    %266 = vector.multi_reduction <add>, %265, %cst_49 [1, 2] : vector<1x2x1xf32> to vector<1xf32>
    %267 = vector.shape_cast %266 : vector<1xf32> to vector<1x1x1xf32>
    %268 = vector.extract %267[0, 0, 0] : f32 from vector<1x1x1xf32>
    %cst_50 = arith.constant 0.0416666679 : f32
    %269 = arith.mulf %268, %cst_50 : f32
    %270 = vector.shape_cast %264 : vector<2x1xf32> to vector<1x2x1xf32>
    %cst_51 = arith.constant dense<0.000000e+00> : vector<1xf32>
    %271 = vector.multi_reduction <add>, %270, %cst_51 [1, 2] : vector<1x2x1xf32> to vector<1xf32>
    %272 = vector.shape_cast %271 : vector<1xf32> to vector<1x1x1xf32>
    %273 = vector.extract %272[0, 0, 0] : f32 from vector<1x1x1xf32>
    %cst_52 = arith.constant 0.0416666679 : f32
    %274 = arith.mulf %273, %cst_52 : f32
    %275 = arith.mulf %258, %212 : vector<2x128xf32>
    %cst_53 = arith.constant dense<0.000000e+00> : vector<2xf32>
    %276 = vector.multi_reduction <add>, %275, %cst_53 [1] : vector<2x128xf32> to vector<2xf32>
    %277 = vector.shape_cast %276 : vector<2xf32> to vector<2x1xf32>
    %278 = arith.mulf %275, %258 : vector<2x128xf32>
    %cst_54 = arith.constant dense<0.000000e+00> : vector<2xf32>
    %279 = vector.multi_reduction <add>, %278, %cst_54 [1] : vector<2x128xf32> to vector<2xf32>
    %280 = vector.shape_cast %279 : vector<2xf32> to vector<2x1xf32>
    %281 = vector.shape_cast %277 : vector<2x1xf32> to vector<1x2x1xf32>
    %cst_55 = arith.constant dense<0.000000e+00> : vector<1xf32>
    %282 = vector.multi_reduction <add>, %281, %cst_55 [1, 2] : vector<1x2x1xf32> to vector<1xf32>
    %283 = vector.shape_cast %282 : vector<1xf32> to vector<1x1x1xf32>
    %284 = vector.extract %283[0, 0, 0] : f32 from vector<1x1x1xf32>
    %cst_56 = arith.constant 0.0416666679 : f32
    %285 = arith.mulf %284, %cst_56 : f32
    %286 = vector.shape_cast %280 : vector<2x1xf32> to vector<1x2x1xf32>
    %cst_57 = arith.constant dense<0.000000e+00> : vector<1xf32>
    %287 = vector.multi_reduction <add>, %286, %cst_57 [1, 2] : vector<1x2x1xf32> to vector<1xf32>
    %288 = vector.shape_cast %287 : vector<1xf32> to vector<1x1x1xf32>
    %289 = vector.extract %288[0, 0, 0] : f32 from vector<1x1x1xf32>
    %cst_58 = arith.constant 0.0416666679 : f32
    %290 = arith.mulf %289, %cst_58 : f32
    %291 = arith.mulf %269, %269 : f32
    %292 = arith.subf %274, %291 : f32
    %cst_59 = arith.constant 0.000000e+00 : f32
    %293 = arith.maximumf %292, %cst_59 : f32
    %c36 = arith.constant 36 : index
    %294 = memref.load %arg1[%c36] : memref<40xf32, #tpu.memory_space<smem>>
    %cst_60 = arith.constant 9.99999974E-6 : f32
    %295 = arith.addf %293, %cst_60 : f32
    %296 = math.rsqrt %295 : f32
    %297 = arith.mulf %294, %296 : f32
    %c38 = arith.constant 38 : index
    %298 = memref.load %arg1[%c38] : memref<40xf32, #tpu.memory_space<smem>>
    %299 = arith.mulf %269, %297 : f32
    %300 = arith.subf %298, %299 : f32
    %301 = vector.broadcast %297 : f32 to vector<2x128xf32>
    %302 = arith.mulf %235, %301 : vector<2x128xf32>
    %303 = vector.broadcast %300 : f32 to vector<2x128xf32>
    %304 = arith.addf %302, %303 : vector<2x128xf32>
    %cst_61 = arith.constant 0.000000e+00 : f32
    %305 = vector.broadcast %cst_61 : f32 to vector<2x128xf32>
    %306 = arith.maximumf %304, %305 : vector<2x128xf32>
    %307 = arith.mulf %285, %285 : f32
    %308 = arith.subf %290, %307 : f32
    %cst_62 = arith.constant 0.000000e+00 : f32
    %309 = arith.maximumf %308, %cst_62 : f32
    %c37 = arith.constant 37 : index
    %310 = memref.load %arg1[%c37] : memref<40xf32, #tpu.memory_space<smem>>
    %cst_63 = arith.constant 9.99999974E-6 : f32
    %311 = arith.addf %309, %cst_63 : f32
    %312 = math.rsqrt %311 : f32
    %313 = arith.mulf %310, %312 : f32
    %c39 = arith.constant 39 : index
    %314 = memref.load %arg1[%c39] : memref<40xf32, #tpu.memory_space<smem>>
    %315 = arith.mulf %285, %313 : f32
    %316 = arith.subf %314, %315 : f32
    %317 = vector.broadcast %313 : f32 to vector<2x128xf32>
    %318 = arith.mulf %258, %317 : vector<2x128xf32>
    %319 = vector.broadcast %316 : f32 to vector<2x128xf32>
    %320 = arith.addf %318, %319 : vector<2x128xf32>
    %cst_64 = arith.constant 0.000000e+00 : f32
    %321 = vector.broadcast %cst_64 : f32 to vector<2x128xf32>
    %322 = arith.maximumf %320, %321 : vector<2x128xf32>
    %c0_65 = arith.constant 0 : index
    %c0_66 = arith.constant 0 : index
    %c0_67 = arith.constant 0 : index
    %323 = vector.load %arg2[%c0_65, %c0_66, %c0_67] : memref<2x2x128xf32, #tpu.memory_space<vmem>>, vector<1x2x128xf32>
    %324 = vector.shape_cast %323 : vector<1x2x128xf32> to vector<2x128xf32>
    %325 = vector.shape_cast %306 : vector<2x128xf32> to vector<1x2x128xf32>
    tpu.vector_store %arg2[%c0_65, %c0_66, %c0_67], %325 {strides = array<i32>} : memref<2x2x128xf32, #tpu.memory_space<vmem>>, vector<1x2x128xf32>,
    %c1_68 = arith.constant 1 : index
    %c0_69 = arith.constant 0 : index
    %c0_70 = arith.constant 0 : index
    %326 = vector.load %arg2[%c1_68, %c0_69, %c0_70] : memref<2x2x128xf32, #tpu.memory_space<vmem>>, vector<1x2x128xf32>
    %327 = vector.shape_cast %326 : vector<1x2x128xf32> to vector<2x128xf32>
    %328 = vector.shape_cast %322 : vector<2x128xf32> to vector<1x2x128xf32>
    tpu.vector_store %arg2[%c1_68, %c0_69, %c0_70], %328 {strides = array<i32>} : memref<2x2x128xf32, #tpu.memory_space<vmem>>, vector<1x2x128xf32>,
    return
  }
}

</mosaic_0001>

<bundles_post_ra>
// kernel: model_forward.1
= control target key start
LH: loop header
LB: loop body
LE: loop exit
PB: predicated region body
PF: predicated region fallthrough
CT: control target
= control target key end

     0   :  { %7 = vsyncpa [#allocation3], 0  ;;  %s708_s0 = inlined_call_operand.vmem [shape: f32[2,2,128], index: 0, kind: input, shape index: {}]   ;;  %s709_s1 = inlined_call_operand.vmem [shape: f32[40], index: 1, kind: input, shape index: {}]   ;;  %s710_s2 = inlined_call_operand.vmem [shape: f32[2,2,128], index: 2, kind: output, shape index: {}]  }
   0x1   :  { %s16_s11 = sshll.u32 %s709_s1, 4  ;;  %s17_s11 = int_to_ptr.vmem [resolvable:$true] %s16_s11 }
   0x2   :  { %s549_s12 = scalar_lea.vmem %s17_s11, 16  ;;  %p554_p1 = scmp.lt.s32.totalorder %s17_s11, %s17_s11 }
   0x3   :  { %p550_p0 = scmp.ne.s32.totalorder %s17_s11, %s549_s12  ;;  %p555_p2 = scmp.lt.s32.totalorder %s549_s12, %s549_s12 }
   0x5   :  { %p556_p3 = por %p555_p2, %p554_p1 }
   0x7   :  { %p557_p4 = pnand %p556_p3, %p550_p0 }
   0x9   :  { %560 = shalt.err (!%p557_p4)
}
   0xa   :  { %s563_s13 = smov [#allocation2]  }
   0xb   :  { %19 = dma.vmem_to_smem %s17_s11, 16, %s563_s13, [#allocation3]  }
   0xc   :  { %561 = dma.done.wait [#allocation3], 16  }
   0xd   :  { %562 = vsyncadd [#allocation3], 4294967280 }
   0xe   :  { %23 = sfence }
   0xf   :  { %v24_v0 = vld [vmem:[%s708_s0] sm:$0x3]  ;;  %s564_s16 = smov 127   ;;  %v452_v1 = vld [vmem:[%s708_s0 + $0x2] sm:$0x3]  ;;  %s36_s18 = sld [smem:[#allocation2]]  ;;  %v27_v2 = vlaneseq }
  0x10   :  { %29 = vrot.lane.b32.xlu0 %v24_v0, %s564_s16  ;;  %s457_s19 = sld [smem:[#allocation2 + $0x4]]  ;;  %s455_s20 = sld [smem:[#allocation2 + $0x2]]  ;;  %v565_v26 = vmov 0.0   ;;  %vm67_vm1 = vcmask 1041408   ;;  %vm75_vm2 = vcmask 1024  }
  0x11   :  { %s459_s21 = sld [smem:[#allocation2 + $0x6]]  ;;  %s454_s22 = sld [smem:[#allocation2 + $0x1]]  ;;  %v594_v11 = vand.u32 127, %v27_v2 }
  0x12   :  { %s458_s23 = sld [smem:[#allocation2 + $0x5]]  ;;  %s456_s24 = sld [smem:[#allocation2 + $0x3]] }
  0x13   :  { %s460_s25 = sld [smem:[#allocation2 + $0x7]]  ;;  %vm33_vm0 = vcmp.lt.s32.totalorder %v594_v11, 15  ;;  %s566_s7 = smov 0.0   ;;  %vm166_vm3 = vcmp.lt.s32.totalorder %v594_v11, 14  ;;  %vm301_vm4 = vcmp.lt.s32.totalorder %v594_v11, 12 }
  0x14   :  { %31 = vrot.lane.b32.xlu0 %v452_v1, %s564_s16  ;;  %v453_v27 = vsel %vm33_vm0, 1.0, %v565_v26  ;;  %s461_s14 = sld [smem:[#allocation2 + $0x8]]  ;;  %s462_s15 = sld [smem:[#allocation2 + $0xa]] }
  0x15   :  { %v37_v3 = vstv %s36_s18  ;;  %s463_s1 = sld [smem:[#allocation2 + $0x9]] }
  0x16   :  { %v52_v4 = vstv %s457_s19  ;;  %v44_v5 = vstv %s455_s20  ;;  %v38_v9 = vmul.f32 %v37_v3, %v24_v0  ;;  %s464_s19 = sld [smem:[#allocation2 + $0xb]] }
  0x17   :  { %v59_v6 = vstv %s459_s21  ;;  %v40_v7 = vstv %s454_s22  ;;  %v53_v10 = vmul.f32 %v52_v4, %v24_v0  ;;  %v45_v13 = vmul.f32 %v452_v1, %v44_v5 }
  0x18   :  { %v55_v8 = vstv %s458_s23  ;;  %v60_v14 = vmul.f32 %v452_v1, %v59_v6  ;;  %v48_v17 = vstv %s456_s24 }
  0x19   :  { %v63_v18 = vstv %s460_s25 }
  0x82   :  { %v30_v12 = vpop.permute.xlu0 %29 }
  0x83   :  { %v41_v15 = vmul.f32 %v40_v7, %v30_v12  ;;  %v56_v16 = vmul.f32 %v55_v8, %v30_v12 }
  0x85   :  { %v42_v19 = vadd.f32 %v41_v15, %v38_v9  ;;  %v57_v20 = vadd.f32 %v56_v16, %v53_v10 }
  0x86   :  { %v32_v21 = vpop.permute.xlu0 %31 }
  0x87   :  { %v46_v22 = vadd.f32 %v45_v13, %v42_v19  ;;  %v49_v23 = vmul.f32 %v48_v17, %v32_v21  ;;  %v61_v24 = vadd.f32 %v60_v14, %v57_v20  ;;  %v64_v25 = vmul.f32 %v63_v18, %v32_v21 }
  0x89   :  { %v598_v28 = vadd.f32 %v49_v23, %v46_v22  ;;  %v600_v29 = vadd.f32 %v64_v25, %v61_v24 }
  0x8b   :  { %v98_v30 = vmul.f32 %v453_v27, %v600_v29  ;;  %v66_v31 = vmul.f32 %v453_v27, %v598_v28 }
  0x8d   :  { %v99_v32 = vsel %vm67_vm1, %v98_v30, 0.0  ;;  %v68_v33 = vsel %vm67_vm1, %v66_v31, 0.0  ;;  %v71_v34 = vmul.f32 %v66_v31, %v598_v28  ;;  %v102_v36 = vmul.f32 %v98_v30, %v600_v29 }
  0x8e   :  { %100 = vadd.xlane.f32.xlu0 %v99_v32  ;;  %69 = vadd.xlane.f32.xlu1 %v68_v33 }
  0x8f   :  { %v72_v35 = vsel %vm67_vm1, %v71_v34, 0.0  ;;  %v103_v37 = vsel %vm67_vm1, %v102_v36, 0.0 }
  0x92   :  { %73 = vadd.xlane.f32.xlu1 %v72_v35 }
  0x96   :  { %104 = vadd.xlane.f32.xlu1 %v103_v37 }
 0x11b   :  { %v70_v38 = vpop.xlane.xlu1 %69  ;;  %v101_v40 = vpop.xlane.xlu0 %100 }
 0x11c   :  { %v76_v39 = vsel %vm75_vm2, %v70_v38, 0.0  ;;  %v106_v42 = vsel %vm75_vm2, %v101_v40, 0.0 }
 0x11d   :  { %77 = vadd.xlane.f32.xlu1 %v76_v39 }
 0x11f   :  { %v74_v41 = vpop.xlane.xlu1 %73 }
 0x120   :  { %v87_v43 = vsel %vm75_vm2, %v74_v41, 0.0 }
 0x121   :  { %107 = vadd.xlane.f32.xlu1 %v106_v42 }
 0x123   :  { %v105_v44 = vpop.xlane.xlu1 %104 }
 0x124   :  { %v117_v45 = vsel %vm75_vm2, %v105_v44, 0.0 }
 0x125   :  { %88 = vadd.xlane.f32.xlu1 %v87_v43 }
 0x129   :  { %118 = vadd.xlane.f32.xlu1 %v117_v45 }
 0x1aa   :  { %v78_v46 = vpop.xlane.xlu1 %77 }
 0x1ab   :  { %v79_v47 = vrot.slane %v78_v46, 4 }
 0x1ad   :  { %v80_v48 = vadd.f32 %v79_v47, %v78_v46 }
 0x1ae   :  { %v108_v49 = vpop.xlane.xlu1 %107 }
 0x1af   :  { %v81_v50 = vrot.slane %v80_v48, 2  ;;  %v109_v51 = vrot.slane %v108_v49, 4 }
 0x1b1   :  { %v110_v52 = vadd.f32 %v109_v51, %v108_v49  ;;  %v82_v53 = vadd.f32 %v81_v50, %v80_v48  ;;  %v465_v48 = vsel %vm166_vm3, 1.0, %v565_v26 }
 0x1b2   :  { %v89_v54 = vpop.xlane.xlu1 %88 }
 0x1b3   :  { %v111_v55 = vrot.slane %v110_v52, 2  ;;  %v90_v56 = vrot.slane %v89_v54, 4  ;;  %v83_v57 = vrot.slane %v82_v53, 1 }
 0x1b5   :  { %v91_v58 = vadd.f32 %v90_v56, %v89_v54  ;;  %v84_v59 = vadd.f32 %v83_v57, %v82_v53  ;;  %v112_v61 = vadd.f32 %v111_v55, %v110_v52 }
 0x1b6   :  { %v119_v60 = vpop.xlane.xlu1 %118 }
 0x1b7   :  { %v92_v62 = vrot.slane %v91_v58, 2  ;;  %v120_v63 = vrot.slane %v119_v60, 4  ;;  %496 = vpush %v84_v59  ;;  %v113_v2 = vrot.slane %v112_v61, 1 }
 0x1b9   :  { %v121_v0 = vadd.f32 %v120_v63, %v119_v60  ;;  %v93_v1 = vadd.f32 %v92_v62, %v91_v58  ;;  %v114_v7 = vadd.f32 %v113_v2, %v112_v61 }
 0x1bb   :  { %v122_v3 = vrot.slane %v121_v0, 2  ;;  %v94_v4 = vrot.slane %v93_v1, 1 }
 0x1bd   :  { %v95_v5 = vadd.f32 %v94_v4, %v93_v1  ;;  %v123_v6 = vadd.f32 %v122_v3, %v121_v0 }
 0x1bf   :  { %498 = vpush %v95_v5  ;;  %v124_v8 = vrot.slane %v123_v6, 1 }
 0x1c0   :  { %500 = vpush %v114_v7 }
 0x1c1   :  { %v125_v9 = vadd.f32 %v124_v8, %v123_v6 }
 0x1c3   :  { %502 = vpush %v125_v9 }
 0x1e8   :  { %s497_s0 = spop %496 }
 0x1e9   :  { %s614_s26 = smul.f32 0.033333335, %s497_s0  ;;  %s466_s0 = sld [smem:[#allocation2 + $0xc]] }
 0x1eb   :  { %s128_s27 = smul.f32 %s614_s26, %s614_s26 }
 0x1ef   :  { %v170_v25 = vstv %s466_s0 }
 0x1f0   :  { %s499_s28 = spop %498 }
 0x1f1   :  { %s97_s29 = smul.f32 0.033333335, %s499_s28  ;;  %s501_s30 = spop %500 }
 0x1f2   :  { %s618_s3 = smul.f32 0.033333335, %s501_s30  ;;  %s471_s28 = sld [smem:[#allocation2 + $0x11]] }
 0x1f3   :  { %s129_s4 = ssub.f32 %s97_s29, %s128_s27  ;;  %s467_s27 = sld [smem:[#allocation2 + $0xd]] }
 0x1f4   :  { %s145_s5 = smul.f32 %s618_s3, %s618_s3  ;;  %s503_s6 = spop %502 }
 0x1f5   :  { %s130_s8 = smax.f32 %s566_s7, %s129_s4  ;;  %s127_s9 = smul.f32 0.033333335, %s503_s6 }
 0x1f6   :  { %s132_s10 = sadd.f32 1e-05, %s130_s8  ;;  %s468_s29 = sld [smem:[#allocation2 + $0xe]] }
 0x1f7   :  { %s146_s11 = ssub.f32 %s127_s9, %s145_s5  ;;  %s472_s30 = sld [smem:[#allocation2 + $0x12]] }
 0x1f8   :  { %v133_v10 = vstv %s132_s10  ;;  %s473_s4 = sld [smem:[#allocation2 + $0x13]] }
 0x1f9   :  { %537 = vrsqrt.f32 %v133_v10  ;;  %s147_s12 = smax.f32 %s566_s7, %s146_s11  ;;  %v173_v27 = vstv %s467_s27 }
 0x1fa   :  { %s149_s13 = sadd.f32 1e-05, %s147_s12 }
 0x1fc   :  { %v150_v12 = vstv %s149_s13  ;;  %v177_v31 = vstv %s468_s29 }
 0x1fd   :  { %539 = vrsqrt.f32 %v150_v12  ;;  %v192_v32 = vstv %s472_s30 }
 0x1fe   :  { %v196_v38 = vstv %s473_s4 }
 0x203   :  { %v538_v13 = vpop.eup %537 }
 0x204   :  { %504 = vpush %v538_v13 }
 0x207   :  { %v540_v14 = vpop.eup %539 }
 0x208   :  { %506 = vpush %v540_v14 }
 0x235   :  { %s505_s17 = spop %504 }
 0x236   :  { %s136_s18 = smul.f32 %s505_s17, %s461_s14 }
 0x238   :  { %s138_s20 = smul.f32 %s136_s18, %s614_s26  ;;  %v140_v15 = vstv %s136_s18  ;;  %s470_s26 = sld [smem:[#allocation2 + $0x10]] }
 0x239   :  { %s507_s21 = spop %506  ;;  %v141_v16 = vmul.f32 %v140_v15, %v598_v28 }
 0x23a   :  { %s139_s22 = ssub.f32 %s462_s15, %s138_s20  ;;  %s153_s23 = smul.f32 %s507_s21, %s463_s1 }
 0x23c   :  { %v142_v17 = vstv %s139_s22  ;;  %s155_s24 = smul.f32 %s153_s23, %s618_s3  ;;  %v157_v18 = vstv %s153_s23  ;;  %s469_s3 = sld [smem:[#allocation2 + $0xf]] }
 0x23d   :  { %v143_v19 = vadd.f32 %v142_v17, %v141_v16  ;;  %v158_v20 = vmul.f32 %v157_v18, %v600_v29  ;;  %v188_v29 = vstv %s471_s28  ;;  %s474_s22 = sld [smem:[#allocation2 + $0x14]]  ;;  %s475_s23 = sld [smem:[#allocation2 + $0x16]] }
 0x23e   :  { %s156_s25 = ssub.f32 %s464_s19, %s155_s24  ;;  %v185_v28 = vstv %s470_s26  ;;  %s476_s24 = sld [smem:[#allocation2 + $0x15]] }
 0x23f   :  { %v144_v21 = vmax.f32 %v143_v19, 0.0  ;;  %s477_s26 = sld [smem:[#allocation2 + $0x17]] }
 0x240   :  { %v159_v22 = vstv %s156_s25 }
 0x241   :  { %162 = vrot.lane.b32.xlu1 %v144_v21, %s564_s16  ;;  %v160_v23 = vadd.f32 %v159_v22, %v158_v20  ;;  %v171_v33 = vmul.f32 %v170_v25, %v144_v21  ;;  %v186_v35 = vmul.f32 %v185_v28, %v144_v21 }
 0x242   :  { %v181_v37 = vstv %s469_s3 }
 0x243   :  { %v161_v24 = vmax.f32 %v160_v23, 0.0 }
 0x245   :  { %164 = vrot.lane.b32.xlu0 %v161_v24, %s564_s16  ;;  %v178_v41 = vmul.f32 %v177_v31, %v161_v24  ;;  %v193_v42 = vmul.f32 %v192_v32, %v161_v24 }
 0x2b3   :  { %v163_v30 = vpop.permute.xlu1 %162 }
 0x2b4   :  { %v174_v34 = vmul.f32 %v173_v27, %v163_v30  ;;  %v189_v36 = vmul.f32 %v188_v29, %v163_v30 }
 0x2b6   :  { %v175_v39 = vadd.f32 %v174_v34, %v171_v33  ;;  %v190_v40 = vadd.f32 %v189_v36, %v186_v35 }
 0x2b7   :  { %v165_v43 = vpop.permute.xlu0 %164 }
 0x2b8   :  { %v179_v44 = vadd.f32 %v178_v41, %v175_v39  ;;  %v182_v45 = vmul.f32 %v181_v37, %v165_v43  ;;  %v194_v46 = vadd.f32 %v193_v42, %v190_v40  ;;  %v197_v47 = vmul.f32 %v196_v38, %v165_v43 }
 0x2ba   :  { %v632_v49 = vadd.f32 %v182_v45, %v179_v44  ;;  %v634_v50 = vadd.f32 %v197_v47, %v194_v46 }
 0x2bc   :  { %v199_v51 = vmul.f32 %v465_v48, %v632_v49  ;;  %v229_v54 = vmul.f32 %v465_v48, %v634_v50 }
 0x2be   :  { %v200_v52 = vsel %vm67_vm1, %v199_v51, 0.0  ;;  %v203_v53 = vmul.f32 %v199_v51, %v632_v49  ;;  %v230_v56 = vsel %vm67_vm1, %v229_v54, 0.0  ;;  %v233_v57 = vmul.f32 %v229_v54, %v634_v50 }
 0x2bf   :  { %201 = vadd.xlane.f32.xlu1 %v200_v52 }
 0x2c0   :  { %v204_v55 = vsel %vm67_vm1, %v203_v53, 0.0  ;;  %v234_v58 = vsel %vm67_vm1, %v233_v57, 0.0 }
 0x2c1   :  { %205 = vadd.xlane.f32.xlu0 %v204_v55 }
 0x2c3   :  { %231 = vadd.xlane.f32.xlu1 %v230_v56 }
 0x2c7   :  { %235 = vadd.xlane.f32.xlu1 %v234_v58 }
 0x34c   :  { %v202_v59 = vpop.xlane.xlu1 %201 }
 0x34d   :  { %v207_v60 = vsel %vm75_vm2, %v202_v59, 0.0 }
 0x34e   :  { %v206_v61 = vpop.xlane.xlu0 %205  ;;  %208 = vadd.xlane.f32.xlu1 %v207_v60 }
 0x34f   :  { %v218_v62 = vsel %vm75_vm2, %v206_v61, 0.0 }
 0x350   :  { %219 = vadd.xlane.f32.xlu0 %v218_v62  ;;  %v232_v63 = vpop.xlane.xlu1 %231 }
 0x351   :  { %v237_v0 = vsel %vm75_vm2, %v232_v63, 0.0 }
 0x352   :  { %238 = vadd.xlane.f32.xlu1 %v237_v0 }
 0x354   :  { %v236_v1 = vpop.xlane.xlu1 %235 }
 0x355   :  { %v248_v2 = vsel %vm75_vm2, %v236_v1, 0.0 }
 0x356   :  { %249 = vadd.xlane.f32.xlu0 %v248_v2 }
 0x3db   :  { %v209_v3 = vpop.xlane.xlu1 %208 }
 0x3dc   :  { %v210_v4 = vrot.slane %v209_v3, 4 }
 0x3dd   :  { %v220_v5 = vpop.xlane.xlu0 %219 }
 0x3de   :  { %v211_v6 = vadd.f32 %v210_v4, %v209_v3  ;;  %v221_v7 = vrot.slane %v220_v5, 4 }
 0x3df   :  { %v239_v8 = vpop.xlane.xlu1 %238 }
 0x3e0   :  { %v212_v9 = vrot.slane %v211_v6, 2  ;;  %v222_v10 = vadd.f32 %v221_v7, %v220_v5  ;;  %v240_v12 = vrot.slane %v239_v8, 4 }
 0x3e2   :  { %v223_v13 = vrot.slane %v222_v10, 2  ;;  %v241_v14 = vadd.f32 %v240_v12, %v239_v8  ;;  %v213_v15 = vadd.f32 %v212_v9, %v211_v6 }
 0x3e3   :  { %v250_v16 = vpop.xlane.xlu0 %249 }
 0x3e4   :  { %v242_v17 = vrot.slane %v241_v14, 2  ;;  %v251_v18 = vrot.slane %v250_v16, 4  ;;  %v214_v19 = vrot.slane %v213_v15, 1  ;;  %v224_v20 = vadd.f32 %v223_v13, %v222_v10 }
 0x3e6   :  { %v252_v21 = vadd.f32 %v251_v18, %v250_v16  ;;  %v215_v22 = vadd.f32 %v214_v19, %v213_v15  ;;  %v225_v23 = vrot.slane %v224_v20, 1  ;;  %v243_v24 = vadd.f32 %v242_v17, %v241_v14 }
 0x3e8   :  { %v253_v25 = vrot.slane %v252_v21, 2  ;;  %508 = vpush %v215_v22  ;;  %v226_v27 = vadd.f32 %v225_v23, %v224_v20  ;;  %v244_v28 = vrot.slane %v243_v24, 1  ;;  %v478_v20 = vsel %vm301_vm4, 1.0, %v565_v26 }
 0x3ea   :  { %510 = vpush %v226_v27  ;;  %v245_v29 = vadd.f32 %v244_v28, %v243_v24  ;;  %v254_v30 = vadd.f32 %v253_v25, %v252_v21 }
 0x3ec   :  { %512 = vpush %v245_v29  ;;  %v255_v31 = vrot.slane %v254_v30, 1 }
 0x3ee   :  { %v256_v32 = vadd.f32 %v255_v31, %v254_v30 }
 0x3f0   :  { %514 = vpush %v256_v32 }
 0x419   :  { %s509_s5 = spop %508 }
 0x41a   :  { %s648_s6 = smul.f32 0.035714287, %s509_s5  ;;  %s567_s5 = smov 126  }
 0x41b   :  { %s511_s8 = spop %510 }
 0x41c   :  { %s259_s9 = smul.f32 %s648_s6, %s648_s6 }
 0x41d   :  { %s228_s10 = smul.f32 0.035714287, %s511_s8  ;;  %s513_s11 = spop %512 }
 0x41e   :  { %s652_s12 = smul.f32 0.035714287, %s513_s11  ;;  %s485_s8 = sld [smem:[#allocation2 + $0x1e]] }
 0x41f   :  { %s260_s13 = ssub.f32 %s228_s10, %s259_s9  ;;  %s480_s9 = sld [smem:[#allocation2 + $0x19]] }
 0x420   :  { %s276_s14 = smul.f32 %s652_s12, %s652_s12  ;;  %s486_s10 = sld [smem:[#allocation2 + $0x1f]] }
 0x421   :  { %s261_s15 = smax.f32 %s566_s7, %s260_s13  ;;  %s515_s1 = spop %514 }
 0x422   :  { %s263_s17 = sadd.f32 1e-05, %s261_s15  ;;  %s258_s18 = smul.f32 0.035714287, %s515_s1 }
 0x423   :  { %s481_s11 = sld [smem:[#allocation2 + $0x1a]]  ;;  %s482_s13 = sld [smem:[#allocation2 + $0x1b]] }
 0x424   :  { %v264_v33 = vstv %s263_s17  ;;  %s277_s19 = ssub.f32 %s258_s18, %s276_s14  ;;  %s488_s14 = sld [smem:[#allocation2 + $0x21]] }
 0x425   :  { %541 = vrsqrt.f32 %v264_v33  ;;  %s483_s15 = sld [smem:[#allocation2 + $0x1c]]  ;;  %s489_s1 = sld [smem:[#allocation2 + $0x22]]  ;;  %v308_v48 = vstv %s480_s9 }
 0x426   :  { %s278_s20 = smax.f32 %s566_s7, %s277_s19  ;;  %s664_s17 = sld [smem:[#allocation2 + $0x1d]] }
 0x427   :  { %s280_s21 = sadd.f32 1e-05, %s278_s20  ;;  %s666_s18 = sld [smem:[#allocation2 + $0x23]] }
 0x429   :  { %v281_v34 = vstv %s280_s21  ;;  %v312_v51 = vstv %s481_s11  ;;  %v316_v59 = vstv %s482_s13  ;;  %s494_s11 = sld [smem:[#allocation2 + $0x27]] }
 0x42a   :  { %543 = vrsqrt.f32 %v281_v34  ;;  %v339_v61 = vstv %s488_s14 }
 0x42b   :  { %v320_v60 = vstv %s483_s15  ;;  %v343_v62 = vstv %s489_s1 }
 0x42c   :  { %v324_v13 = vstv %s664_s17 }
 0x42d   :  { %v347_v14 = vstv %s666_s18 }
 0x42f   :  { %v542_v35 = vpop.eup %541 }
 0x430   :  { %516 = vpush %v542_v35 }
 0x434   :  { %v544_v36 = vpop.eup %543 }
 0x435   :  { %518 = vpush %v544_v36 }
 0x461   :  { %s517_s25 = spop %516 }
 0x462   :  { %s267_s0 = smul.f32 %s517_s25, %s474_s22 }
 0x464   :  { %s269_s27 = smul.f32 %s267_s0, %s648_s6  ;;  %v271_v37 = vstv %s267_s0  ;;  %s479_s6 = sld [smem:[#allocation2 + $0x18]] }
 0x465   :  { %v272_v38 = vmul.f32 %v271_v37, %v632_v49  ;;  %v328_v49 = vstv %s485_s8  ;;  %s493_s8 = sld [smem:[#allocation2 + $0x25]] }
 0x466   :  { %s270_s28 = ssub.f32 %s475_s23, %s269_s27  ;;  %s519_s29 = spop %518 }
 0x467   :  { %s284_s30 = smul.f32 %s519_s29, %s476_s24 }
 0x468   :  { %v273_v39 = vstv %s270_s28 }
 0x469   :  { %v274_v40 = vadd.f32 %v273_v39, %v272_v38  ;;  %s286_s3 = smul.f32 %s284_s30, %s652_s12  ;;  %v288_v41 = vstv %s284_s30  ;;  %s487_s12 = sld [smem:[#allocation2 + $0x20]] }
 0x46a   :  { %v289_v43 = vmul.f32 %v288_v41, %v634_v50  ;;  %v305_v47 = vstv %s479_s6  ;;  %v331_v50 = vstv %s486_s10  ;;  %s492_s6 = sld [smem:[#allocation2 + $0x26]] }
 0x46b   :  { %v275_v42 = vmax.f32 %v274_v40, 0.0  ;;  %s287_s4 = ssub.f32 %s477_s26, %s286_s3 }
 0x46d   :  { %v290_v44 = vstv %s287_s4  ;;  %295 = vrot.lane.b32.xlu0 %v275_v42, %s567_s5  ;;  %293 = vrot.lane.b32.xlu1 %v275_v42, %s564_s16  ;;  %v306_v55 = vmul.f32 %v305_v47, %v275_v42  ;;  %v329_v57 = vmul.f32 %v328_v49, %v275_v42 }
 0x46e   :  { %v291_v45 = vadd.f32 %v290_v44, %v289_v43 }
 0x46f   :  { %v335_v52 = vstv %s487_s12 }
 0x470   :  { %v292_v46 = vmax.f32 %v291_v45, 0.0 }
 0x472   :  { %297 = vrot.lane.b32.xlu1 %v292_v46, %s564_s16  ;;  %v317_v6 = vmul.f32 %v316_v59, %v292_v46  ;;  %v340_v7 = vmul.f32 %v339_v61, %v292_v46 }
 0x476   :  { %299 = vrot.lane.b32.xlu1 %v292_v46, %s567_s5  ;;  %s491_s5 = sld [smem:[#allocation2 + $0x24]] }
 0x4df   :  { %v296_v53 = vpop.permute.xlu0 %295  ;;  %v294_v54 = vpop.permute.xlu1 %293 }
 0x4e0   :  { %v309_v56 = vmul.f32 %v308_v48, %v294_v54  ;;  %v332_v58 = vmul.f32 %v331_v50, %v294_v54  ;;  %v313_v63 = vmul.f32 %v312_v51, %v296_v53  ;;  %v336_v0 = vmul.f32 %v335_v52, %v296_v53 }
 0x4e2   :  { %v310_v1 = vadd.f32 %v309_v56, %v306_v55  ;;  %v333_v2 = vadd.f32 %v332_v58, %v329_v57 }
 0x4e4   :  { %v314_v3 = vadd.f32 %v313_v63, %v310_v1  ;;  %v337_v4 = vadd.f32 %v336_v0, %v333_v2  ;;  %v298_v5 = vpop.permute.xlu1 %297 }
 0x4e5   :  { %v321_v8 = vmul.f32 %v320_v60, %v298_v5  ;;  %v344_v9 = vmul.f32 %v343_v62, %v298_v5 }
 0x4e6   :  { %v318_v10 = vadd.f32 %v317_v6, %v314_v3  ;;  %v341_v12 = vadd.f32 %v340_v7, %v337_v4 }
 0x4e8   :  { %v300_v15 = vpop.permute.xlu1 %299  ;;  %v322_v16 = vadd.f32 %v321_v8, %v318_v10  ;;  %v345_v17 = vadd.f32 %v344_v9, %v341_v12 }
 0x4e9   :  { %v325_v18 = vmul.f32 %v324_v13, %v300_v15  ;;  %v348_v19 = vmul.f32 %v347_v14, %v300_v15 }
 0x4eb   :  { %v672_v21 = vadd.f32 %v325_v18, %v322_v16  ;;  %v674_v22 = vadd.f32 %v348_v19, %v345_v17 }
 0x4ed   :  { %v350_v23 = vmul.f32 %v478_v20, %v672_v21  ;;  %v380_v27 = vmul.f32 %v478_v20, %v674_v22 }
 0x4ef   :  { %v351_v24 = vsel %vm67_vm1, %v350_v23, 0.0  ;;  %v354_v25 = vmul.f32 %v350_v23, %v672_v21  ;;  %v381_v28 = vsel %vm67_vm1, %v380_v27, 0.0  ;;  %v384_v26 = vmul.f32 %v380_v27, %v674_v22 }
 0x4f0   :  { %352 = vadd.xlane.f32.xlu0 %v351_v24 }
 0x4f1   :  { %v355_v11 = vsel %vm67_vm1, %v354_v25, 0.0  ;;  %v385_v29 = vsel %vm67_vm1, %v384_v26, 0.0 }
 0x4f2   :  { %356 = vadd.xlane.f32.xlu1 %v355_v11 }
 0x4f4   :  { %382 = vadd.xlane.f32.xlu0 %v381_v28 }
 0x4f8   :  { %386 = vadd.xlane.f32.xlu0 %v385_v29 }
 0x57d   :  { %v353_v30 = vpop.xlane.xlu0 %352 }
 0x57e   :  { %v358_v31 = vsel %vm75_vm2, %v353_v30, 0.0 }
 0x57f   :  { %v357_v32 = vpop.xlane.xlu1 %356  ;;  %359 = vadd.xlane.f32.xlu1 %v358_v31 }
 0x580   :  { %v369_v33 = vsel %vm75_vm2, %v357_v32, 0.0 }
 0x581   :  { %370 = vadd.xlane.f32.xlu0 %v369_v33  ;;  %v383_v34 = vpop.xlane.xlu0 %382 }
 0x582   :  { %v388_v35 = vsel %vm75_vm2, %v383_v34, 0.0 }
 0x583   :  { %389 = vadd.xlane.f32.xlu1 %v388_v35 }
 0x585   :  { %v387_v36 = vpop.xlane.xlu0 %386 }
 0x586   :  { %v399_v37 = vsel %vm75_vm2, %v387_v36, 0.0 }
 0x587   :  { %400 = vadd.xlane.f32.xlu0 %v399_v37 }
 0x60c   :  { %v360_v38 = vpop.xlane.xlu1 %359 }
 0x60d   :  { %v361_v39 = vrot.slane %v360_v38, 4 }
 0x60e   :  { %v371_v40 = vpop.xlane.xlu0 %370 }
 0x60f   :  { %v362_v41 = vadd.f32 %v361_v39, %v360_v38  ;;  %v372_v42 = vrot.slane %v371_v40, 4 }
 0x610   :  { %v390_v43 = vpop.xlane.xlu1 %389 }
 0x611   :  { %v363_v44 = vrot.slane %v362_v41, 2  ;;  %v373_v45 = vadd.f32 %v372_v42, %v371_v40  ;;  %v391_v46 = vrot.slane %v390_v43, 4 }
 0x613   :  { %v374_v47 = vrot.slane %v373_v45, 2  ;;  %v392_v48 = vadd.f32 %v391_v46, %v390_v43  ;;  %v364_v49 = vadd.f32 %v363_v44, %v362_v41 }
 0x614   :  { %v401_v50 = vpop.xlane.xlu0 %400 }
 0x615   :  { %v393_v51 = vrot.slane %v392_v48, 2  ;;  %v402_v52 = vrot.slane %v401_v50, 4  ;;  %v365_v53 = vrot.slane %v364_v49, 1  ;;  %v375_v54 = vadd.f32 %v374_v47, %v373_v45 }
 0x617   :  { %v394_v55 = vadd.f32 %v393_v51, %v392_v48  ;;  %v403_v56 = vadd.f32 %v402_v52, %v401_v50  ;;  %v366_v57 = vadd.f32 %v365_v53, %v364_v49  ;;  %v376_v58 = vrot.slane %v375_v54, 1 }
 0x619   :  { %v404_v59 = vrot.slane %v403_v56, 2  ;;  %520 = vpush %v366_v57  ;;  %v377_v60 = vadd.f32 %v376_v58, %v375_v54  ;;  %v395_v61 = vrot.slane %v394_v55, 1 }
 0x61b   :  { %v405_v62 = vadd.f32 %v404_v59, %v403_v56  ;;  %522 = vpush %v377_v60  ;;  %v396_v63 = vadd.f32 %v395_v61, %v394_v55 }
 0x61d   :  { %524 = vpush %v396_v63  ;;  %v406_v0 = vrot.slane %v405_v62, 1 }
 0x61f   :  { %v407_v1 = vadd.f32 %v406_v0, %v405_v62 }
 0x621   :  { %526 = vpush %v407_v1 }
 0x64a   :  { %s521_s16 = spop %520 }
 0x64b   :  { %s688_s19 = smul.f32 0.041666668, %s521_s16 }
 0x64c   :  { %s523_s20 = spop %522 }
 0x64d   :  { %s410_s21 = smul.f32 %s688_s19, %s688_s19 }
 0x64e   :  { %s379_s22 = smul.f32 0.041666668, %s523_s20  ;;  %s525_s23 = spop %524 }
 0x64f   :  { %s692_s24 = smul.f32 0.041666668, %s525_s23 }
 0x650   :  { %s411_s25 = ssub.f32 %s379_s22, %s410_s21 }
 0x651   :  { %s427_s0 = smul.f32 %s692_s24, %s692_s24 }
 0x652   :  { %s412_s26 = smax.f32 %s566_s7, %s411_s25  ;;  %s527_s27 = spop %526 }
 0x653   :  { %s414_s28 = sadd.f32 1e-05, %s412_s26  ;;  %s409_s29 = smul.f32 0.041666668, %s527_s27 }
 0x655   :  { %v415_v2 = vstv %s414_s28  ;;  %s428_s30 = ssub.f32 %s409_s29, %s427_s0 }
 0x656   :  { %545 = vrsqrt.f32 %v415_v2 }
 0x657   :  { %s429_s3 = smax.f32 %s566_s7, %s428_s30 }
 0x658   :  { %s431_s4 = sadd.f32 1e-05, %s429_s3 }
 0x65a   :  { %v432_v3 = vstv %s431_s4 }
 0x65b   :  { %547 = vrsqrt.f32 %v432_v3 }
 0x660   :  { %v546_v4 = vpop.eup %545 }
 0x661   :  { %528 = vpush %v546_v4 }
 0x665   :  { %v548_v5 = vpop.eup %547 }
 0x666   :  { %530 = vpush %v548_v5 }
 0x692   :  { %s529_s9 = spop %528 }
 0x693   :  { %s418_s10 = smul.f32 %s529_s9, %s491_s5 }
 0x695   :  { %s420_s12 = smul.f32 %s418_s10, %s688_s19  ;;  %v422_v6 = vstv %s418_s10 }
 0x696   :  { %v423_v7 = vmul.f32 %v422_v6, %v672_v21 }
 0x697   :  { %s421_s13 = ssub.f32 %s492_s6, %s420_s12  ;;  %s531_s14 = spop %530 }
 0x698   :  { %s435_s7 = smul.f32 %s531_s14, %s493_s8 }
 0x699   :  { %v424_v8 = vstv %s421_s13 }
 0x69a   :  { %v425_v9 = vadd.f32 %v424_v8, %v423_v7  ;;  %s437_s15 = smul.f32 %s435_s7, %s692_s24  ;;  %v439_v10 = vstv %s435_s7 }
 0x69b   :  { %v440_v13 = vmul.f32 %v439_v10, %v674_v22 }
 0x69c   :  { %v426_v12 = vmax.f32 %v425_v9, 0.0  ;;  %s438_s1 = ssub.f32 %s494_s11, %s437_s15 }
 0x69e   :  { %444 = vst [vmem:[%s710_s2] sm:$0x3] %v426_v12  ;;  %v441_v14 = vstv %s438_s1 }
 0x69f   :  { %v442_v15 = vadd.f32 %v441_v14, %v440_v13 }
 0x6a1   :  { %v443_v16 = vmax.f32 %v442_v15, 0.0 }
 0x6a3   :  { %495 = vst [vmem:[%s710_s2 + $0x2] sm:$0x3] %v443_v16 }
 0x6a4   :  { %451 = vsyncpa [#allocation3], 1 }

</bundles_post_ra>
